<compile_context>
chip_gen: v6e
topology: v6e:2x2x1
jax: 0.10.0
libtpu: 0.0.40
codegen_flags: <defaults>
</compile_context>

<pallas_src>
import math

import jax
import jax.numpy as jnp
from jax.experimental import pallas as pl
from jax.experimental.pallas import tpu as pltpu


def _proxy_linear_kernel(x_ref, w_ref, scale_ref, o_ref):
    # x_ref: (tm, K), w_ref: (tn, K), scale_ref: (1, tn) f32, o_ref: (tm, tn)
    acc = jax.lax.dot_general(
        x_ref[...],
        w_ref[...],
        dimension_numbers=(((1,), (1,)), ((), ())),  # contract K on both sides
        preferred_element_type=jnp.float32,
    )
    # Scaling output columns by 1/||W_row|| == normalizing W rows before the dot.
    o_ref[...] = (acc * scale_ref[...]).astype(o_ref.dtype)


def _round_up(v, m):
    return ((v + m - 1) // m) * m


def proxy_linear(x, weight, *, tm=256, tn=256):
    """x: (M, in_features), weight: (out_features, in_features) -> (M, out_features)."""
    M, K = x.shape
    N, K2 = weight.shape
    assert K == K2, "feature mismatch"

    # Per-output-row inverse L2 norm in f32 (eps matches F.normalize: clamping
    # the norm at 1e-12 == clamping the sum of squares at 1e-24).  Tiny O(N*K)
    # op, hoisted out of the kernel so the grid loop is pure MXU work.
    w32 = weight.astype(jnp.float32)
    inv_norm = jax.lax.rsqrt(jnp.maximum(jnp.sum(w32 * w32, axis=-1), 1e-24))
    inv_norm = inv_norm.reshape(1, N)

    # Tile sizes: full dim if small, otherwise 256 (multiple of 8/128; matches
    # the 256-wide MXU on v6e/v7x and 2x128 tiles on v5e).  Pad when tiling.
    tm = M if M < tm else tm
    tn = N if N < tn else tn
    Mp = _round_up(M, tm)
    Np = _round_up(N, tn)
    xp = x if Mp == M else jnp.pad(x, ((0, Mp - M), (0, 0)))
    wp = weight if Np == N else jnp.pad(weight, ((0, Np - N), (0, 0)))
    sp = inv_norm if Np == N else jnp.pad(inv_norm, ((0, 0), (0, Np - N)))

    # Grid order: N outer / M inner, so the (tn, K) weight block and its scale
    # row stay resident in VMEM while x / out blocks stream through.
    grid = (Np // tn, Mp // tm)

    itemsize = lambda a: jnp.dtype(a.dtype).itemsize
    cost = pl.CostEstimate(
        flops=2 * M * N * K,
        transcendentals=0,
        bytes_accessed=(x.size * itemsize(x)
                        + weight.size * itemsize(weight)
                        + M * N * itemsize(x)),
    )

    out = pl.pallas_call(
        _proxy_linear_kernel,
        out_shape=jax.ShapeDtypeStruct((Mp, Np), x.dtype),
        grid=grid,
        in_specs=[
            pl.BlockSpec((tm, K), lambda j, i: (i, 0)),   # x tile
            pl.BlockSpec((tn, K), lambda j, i: (j, 0)),   # un-normalized weight tile
            pl.BlockSpec((1, tn), lambda j, i: (0, j)),   # per-row inverse norms
        ],
        out_specs=pl.BlockSpec((tm, tn), lambda j, i: (i, j)),
        compiler_params=pltpu.CompilerParams(
            # Both grid axes are independent -> shard across v7x's two TCs
            # (harmless no-op on v5e/v6e).
            dimension_semantics=("parallel", "parallel"),
            # Headroom above the 32 MiB scoped default; still <= 64 MiB (v7x).
            vmem_limit_bytes=48 * 1024 * 1024,
        ),
        cost_estimate=cost,
    )(xp, wp, sp)

    if Mp != M or Np != N:
        out = out[:M, :N]
    # NOTE: K (in_features) is kept whole per block; if in_features ever
    # outgrows VMEM, add a K grid axis with an f32 accumulator scratch and
    # pl.when init/finalize.
    return out


def init_proxy_linear_weight(key, in_features, out_features, dtype=jnp.float32):
    """kaiming_uniform_(a=sqrt(5)) on (out_features, in_features):
    bound = sqrt(6 / ((1 + a^2) * fan_in)) = sqrt(1 / fan_in)."""
    bound = math.sqrt(1.0 / in_features)
    return jax.random.uniform(
        key, (out_features, in_features), dtype=dtype, minval=-bound, maxval=bound
    )


if __name__ == "__main__":
    key = jax.random.PRNGKey(0)
    kx, kw = jax.random.split(key)

    batch = 8
    in_features = 32
    out_features = 16

    x = jax.random.normal(kx, (batch, in_features), dtype=jnp.float32)
    weight = init_proxy_linear_weight(kw, in_features, out_features)

    out = jax.block_until_ready(proxy_linear(x, weight))

    # Reference (same math as the PyTorch forward), high-precision matmul.
    w_n = weight / jnp.maximum(
        jnp.sqrt(jnp.sum(weight * weight, axis=-1, keepdims=True)), 1e-12
    )
    ref = jnp.dot(x, w_n.T, precision=jax.lax.Precision.HIGHEST)

    assert out.shape == (batch, out_features)
    assert jnp.allclose(out, ref, atol=1e-3, rtol=1e-3)

    print("KERNEL_OK")
</pallas_src>

<mosaic_0001>
module attributes {stable_mosaic.version = 11 : i64} {
  func.func @_proxy_linear_kernel(%arg0: i32, %arg1: i32, %arg2: memref<8x32xf32, #tpu.memory_space<vmem>>, %arg3: memref<16x32xf32, #tpu.memory_space<vmem>>, %arg4: memref<1x16xf32, #tpu.memory_space<vmem>>, %arg5: memref<8x16xf32, #tpu.memory_space<vmem>>) attributes {dimension_semantics = [#tpu.dimension_semantics<parallel>, #tpu.dimension_semantics<parallel>], iteration_bounds = array<i64: 1, 1>, scalar_prefetch = 0 : i64, scratch_operands = 0 : i64, tpu.core_type = #tpu.core_type<tc>, window_params = [{transform_indices = @transform_0, window_bounds = array<i64: 8, 32>}, {transform_indices = @transform_1, window_bounds = array<i64: 16, 32>}, {transform_indices = @transform_2, window_bounds = array<i64: 1, 16>}, {transform_indices = @transform_3, window_bounds = array<i64: 8, 16>}]} {
    %c0 = arith.constant 0 : index
    %c0_0 = arith.constant 0 : index
    %0 = vector.load %arg2[%c0, %c0_0] : memref<8x32xf32, #tpu.memory_space<vmem>>, vector<8x32xf32>
    %c0_1 = arith.constant 0 : index
    %c0_2 = arith.constant 0 : index
    %1 = vector.load %arg3[%c0_1, %c0_2] : memref<16x32xf32, #tpu.memory_space<vmem>>, vector<16x32xf32>
    %cst = arith.constant dense<0.000000e+00> : vector<8x16xf32>
    %2 = tpu.matmul %0, %1, %cst {dimension_numbers = #tpu.dot_dimension_numbers<[1], [1], [0], [0], [0, 0, 1, 0], [], []>} : vector<8x32xf32>, vector<16x32xf32>, vector<8x16xf32> -> vector<8x16xf32>
    %c0_3 = arith.constant 0 : index
    %c0_4 = arith.constant 0 : index
    %3 = vector.load %arg4[%c0_3, %c0_4] : memref<1x16xf32, #tpu.memory_space<vmem>>, vector<1x16xf32>
    %4 = vector.broadcast %3 : vector<1x16xf32> to vector<8x16xf32>
    %5 = arith.mulf %2, %4 : vector<8x16xf32>
    %c0_5 = arith.constant 0 : index
    %c0_6 = arith.constant 0 : index
    %6 = vector.load %arg5[%c0_5, %c0_6] : memref<8x16xf32, #tpu.memory_space<vmem>>, vector<8x16xf32>
    tpu.vector_store %arg5[%c0_5, %c0_6], %5 {strides = array<i32>} : memref<8x16xf32, #tpu.memory_space<vmem>>, vector<8x16xf32>,
    return
  }
  func.func @transform_0(%arg0: i32, %arg1: i32) -> (i32, i32) {
    %c0_i32 = arith.constant 0 : i32
    %c0_i32_0 = arith.constant 0 : i32
    return %arg1, %c0_i32 : i32, i32
  }
  func.func @transform_1(%arg0: i32, %arg1: i32) -> (i32, i32) {
    %c0_i32 = arith.constant 0 : i32
    %c0_i32_0 = arith.constant 0 : i32
    return %arg0, %c0_i32 : i32, i32
  }
  func.func @transform_2(%arg0: i32, %arg1: i32) -> (i32, i32) {
    %c0_i32 = arith.constant 0 : i32
    %c0_i32_0 = arith.constant 0 : i32
    return %c0_i32, %arg0 : i32, i32
  }
  func.func @transform_3(%arg0: i32, %arg1: i32) -> (i32, i32) {
    %c0_i32 = arith.constant 0 : i32
    return %arg1, %arg0 : i32, i32
  }
}

</mosaic_0001>

<bundles_post_ra>
// kernel: tpu_custom_call.1
= control target key start
LH: loop header
LB: loop body
LE: loop exit
PB: predicated region body
PF: predicated region fallthrough
CT: control target
= control target key end

     0   :  { %8 = vsyncpa [#allocation3], 0  ;;  %s276_s0 = inlined_call_operand.hbm [shape: f32[8,32], index: 0, kind: input, shape index: {}]   ;;  %s277_s1 = inlined_call_operand.hbm [shape: f32[16,32], index: 1, kind: input, shape index: {}]   ;;  %s278_s2 = inlined_call_operand.vmem [shape: f32[1,16], index: 2, kind: input, shape index: {}]   ;;  %s279_s3 = inlined_call_operand.hbm [shape: f32[8,16], index: 3, kind: output, shape index: {}]  }
   0x1   :  { %9 = vsyncpa [#allocation6], 0 }
   0x2   :  { %10 = vsyncpa [#allocation4], 0  ;;  %s237_s12 = smov [#allocation2]   ;;  %s238_s14 = smov [#allocation5]  }
   0x3   :  { %s17_s13 = sshll.u32 %s237_s12, 4  ;;  %s26_s15 = sshll.u32 %s238_s14, 4  ;;  %s18_s13 = int_to_ptr.vmem [resolvable:$true] %s17_s13  ;;  %s27_s15 = int_to_ptr.vmem [resolvable:$true] %s26_s15 }
   0x4   :  { %s179_s16 = scalar_lea.vmem %s18_s13, 128  ;;  %p184_p1 = scmp.lt.s32.totalorder %s18_s13, %s18_s13 }
   0x5   :  { %p180_p0 = scmp.ne.s32.totalorder %s18_s13, %s179_s16  ;;  %p185_p2 = scmp.lt.s32.totalorder %s179_s16, %s179_s16 }
   0x7   :  { %p186_p3 = por %p185_p2, %p184_p1 }
   0x9   :  { %p187_p4 = pnand %p186_p3, %p180_p0 }
   0xb   :  { %190 = shalt.err (!%p187_p4)
}
   0xc   :  { %20 = dma.hbm_to_vmem [thread:$0]  %s276_s0, 128, %s18_s13, [#allocation3]  }
   0xd   :  { %s199_s19 = scalar_lea.vmem %s27_s15, 256  ;;  %p204_p6 = scmp.lt.s32.totalorder %s27_s15, %s27_s15 }
   0xe   :  { %p200_p5 = scmp.ne.s32.totalorder %s27_s15, %s199_s19  ;;  %p205_p7 = scmp.lt.s32.totalorder %s199_s19, %s199_s19 }
  0x10   :  { %p206_p8 = por %p205_p7, %p204_p6 }
  0x12   :  { %p207_p9 = pnand %p206_p8, %p200_p5 }
  0x14   :  { %210 = shalt.err (!%p207_p9)
}
  0x15   :  { %s239_s20 = smov 128   ;;  %s240_s21 = smov 8  }
  0x16   :  { %32 = dma.hbm_to_vmem [thread:$0]  %s277_s1, 256, %s27_s15, [#allocation6], %s239_s20, %s239_s20, %s240_s21  }
  0x17   :  { %231 = dma.done.wait [#allocation3], 128  }
  0x18   :  { %232 = vsyncadd [#allocation3], 4294967168 }
  0x19   :  { %233 = dma.done.wait [#allocation6], 256  }
  0x1a   :  { %234 = vsyncadd [#allocation6], 4294967040  ;;  %v241_v0 = vmov 0.0   ;;  %vm242_vm0 = vmmov 0   ;;  %vm44_vm1 = vcmask 261120   ;;  %v43_v1 = vld [vmem:[#allocation5 + $0x8] sm:$0xff] }
  0x1b   :  { %157 = vmatprep.subr.mxu0 %v241_v0  ;;  %161 = vmatprep.mubr.msk.f32.mxu0 %vm242_vm0, %v241_v0  ;;  %v42_v2 = vld [vmem:[#allocation5] sm:$0xff]  ;;  %v41_v3 = vld [vmem:[#allocation2] sm:$0xff]  ;;  %s243_s1 = smov [#allocation7]   ;;  %vm132_vm2 = vcmask 130048  }
  0x1c   :  { %158 = vmatpush3.xpose.msk.msra.mxu0 %vm44_vm1, %v43_v1  ;;  %v153_v4 = vld [vmem:[%s278_s2] ss:$0 sm:$0xff]  ;;  %s140_s25 = sshll.u32 %s243_s1, 4  ;;  %s141_s25 = int_to_ptr.vmem [resolvable:$true] %s140_s25 }
  0x1d   :  { %159 = vmatprep.subr.mxu0 %v241_v0  ;;  %s211_s26 = scalar_lea.vmem %s141_s25, 128  ;;  %p216_p11 = scmp.lt.s32.totalorder %s141_s25, %s141_s25 }
  0x1e   :  { %p212_p10 = scmp.ne.s32.totalorder %s141_s25, %s211_s26  ;;  %p217_p12 = scmp.lt.s32.totalorder %s211_s26, %s211_s26 }
  0x20   :  { %160 = vmatpush3.xpose.msk.msra.mxu0 %vm44_vm1, %v42_v2  ;;  %p218_p13 = por %p217_p12, %p216_p11 }
  0x22   :  { %p219_p0 = pnand %p218_p13, %p212_p10 }
  0x23   :  { %162 = vmatmul.mubr.msk.f32.vlgmr.msra.gmra.mxu0 %vm44_vm1, %v41_v3 }
  0xe3   :  { %v120_v5 = vpop.f32.mrf.mxu0 }
  0xe4   :  { %v131_v6 = vmul.f32 %v153_v4, %v120_v5 }
  0xe5   :  { %v163_v7 = vpop.f32.mrf.mxu0 }
  0xe6   :  { %133 = vst.msk [vmem:[#allocation7] sm:$0xff] %vm132_vm2, %v131_v6 }
  0xe7   :  { %222 = shalt.err (!%p219_p0)
}
  0xe8   :  { %143 = dma.vmem_to_hbm [thread:$0]  %s141_s25, 128, %s279_s3, [#allocation4]  }
  0xe9   :  { %235 = dma.done.wait [#allocation4], 128  }
  0xea   :  { %236 = vsyncadd [#allocation4], 4294967168 }
  0xeb   :  { %147 = vsyncpa [#allocation3], 1 }
  0xec   :  { %148 = vsyncpa [#allocation6], 1 }
  0xed   :  { %149 = vsyncpa [#allocation4], 1 }

</bundles_post_ra>
